<compile_context>
chip_gen: v7x
topology: tpu7x:2x2x1
jax: 0.10.0
libtpu: 0.0.40
codegen_flags: <defaults>
</compile_context>

<pallas_src>
import jax
import jax.numpy as jnp
from jax import lax
from jax.experimental import pallas as pl
from jax.experimental.pallas import tpu as pltpu


# Packed-output layout inside the single lane-dense (8, 128) f32 slab:
#   slab[0:8, 0:8]  = G = xp @ xp.T   (xp = [x1; x2] row-stacked, (8, 2))
#       v4 = G[0:4, 0:4], v6 = G[0:4, 4:8], v1 = G[4:8, 0:4]
#   slab[0:4, 8:12] = H = Y.T @ Y     (Y  = [x1 | x2] col-stacked, (4, 4))
#       v3 = H[0:2, 0:2], v2 = H[0:2, 2:4], v5 = H[2:4, 0:2]
_SLAB_SHAPE = (8, 128)


def _matmul_chain_kernel(xp_ref, slab_ref):
    """xp_ref: (8, 2) f32 in VMEM (rows 0-3 = x1, rows 4-7 = x2).
    slab_ref: (8, 128) f32 packed output slab in VMEM."""
    xp = xp_ref[...]                                   # (8, 2)
    x1 = xp[0:4, :]                                    # (4, 2)
    x2 = xp[4:8, :]                                    # (4, 2)
    y = jnp.concatenate([x1, x2], axis=1)              # (4, 4) = [x1 | x2]

    def dg(a, b, ca, cb):
        # Transposed matmuls via contraction dims -> no explicit transpose.
        return lax.dot_general(
            a, b, (((ca,), (cb,)), ((), ())),
            preferred_element_type=jnp.float32)

    # Two back-to-back pushes cover all six products as Gram sub-blocks.
    gram = dg(xp, xp, 1, 1)                            # (8, 8) row-Gram
    h = dg(y, y, 0, 0)                                 # (4, 4) column-Gram

    # Compose the full slab in registers, then ONE unmasked full-tile store.
    h_pad = jnp.pad(h, ((0, 4), (0, 0)))               # (8, 4)
    left = jnp.concatenate([gram, h_pad], axis=1)      # (8, 12)
    slab = jnp.pad(left, ((0, 0), (0, _SLAB_SHAPE[1] - left.shape[1])))
    slab_ref[...] = slab


@jax.jit
def model_forward(x1, x2):
    """Mirrors Model.forward's defined computation.

    x1, x2: (2, 4) float32.  Returns dict of the six matmul products; the
    last well-defined value of x3 is v6 = x1 @ x2.T.
    """
    # Glue (reshape / concat / slicing) stays in plain JAX; the matmuls run in
    # a single grid-free Pallas call with packed I/O.
    x1r = x1.reshape(4, 2).astype(jnp.float32)
    x2r = x2.reshape(4, 2).astype(jnp.float32)
    xp = jnp.concatenate([x1r, x2r], axis=0)           # (8, 2): one input DMA

    slab = pl.pallas_call(
        _matmul_chain_kernel,
        out_shape=jax.ShapeDtypeStruct(_SLAB_SHAPE, jnp.float32),
        in_specs=[pl.BlockSpec(memory_space=pltpu.MemorySpace.VMEM)],
        out_specs=pl.BlockSpec(memory_space=pltpu.MemorySpace.VMEM),
    )(xp)

    v4 = slab[0:4, 0:4]            # x1 @ x1.T
    v6 = slab[0:4, 4:8]            # x1 @ x2.T  (final x3)
    v1 = slab[4:8, 0:4]            # x2 @ x1.T
    v3 = slab[0:2, 8:10]           # x1.T @ x1
    v2 = slab[0:2, 10:12]          # x1.T @ x2
    v5 = slab[2:4, 8:10]           # x2.T @ x1

    return {"v1": v1, "v2": v2, "v3": v3, "v4": v4, "v5": v5,
            "v6": v6, "x3": v6}


if __name__ == "__main__":
    key = jax.random.PRNGKey(0)
    k1, k2 = jax.random.split(key)
    x1 = jax.random.normal(k1, (2, 4), dtype=jnp.float32)
    x2 = jax.random.normal(k2, (2, 4), dtype=jnp.float32)

    out = model_forward(x1, x2)
    out = jax.tree_util.tree_map(jax.block_until_ready, out)

    # Sanity check against plain-JAX reference.
    x1r = x1.reshape(4, 2)
    x2r = x2.reshape(4, 2)
    ref = {
        "v1": x2r @ x1r.T, "v2": x1r.T @ x2r, "v3": x1r.T @ x1r,
        "v4": x1r @ x1r.T, "v5": x2r.T @ x1r, "v6": x1r @ x2r.T,
    }
    for name, r in ref.items():
        assert jnp.allclose(out[name], r, atol=1e-5, rtol=1e-5), name

    print("KERNEL_OK")
</pallas_src>

<mosaic_0001>
module attributes {stable_mosaic.version = 11 : i64} {
  func.func @_matmul_chain_kernel(%arg0: memref<8x2xf32, #tpu.memory_space<vmem>>, %arg1: memref<8x128xf32, #tpu.memory_space<vmem>>) attributes {dimension_semantics = [], scalar_prefetch = 0 : i64, scratch_operands = 0 : i64, tpu.core_type = #tpu.core_type<tc>} {
    %c0 = arith.constant 0 : index
    %c0_0 = arith.constant 0 : index
    %0 = vector.load %arg0[%c0, %c0_0] : memref<8x2xf32, #tpu.memory_space<vmem>>, vector<8x2xf32>
    %1 = vector.extract_strided_slice %0 {offsets = [0, 0], sizes = [4, 2], strides = [1, 1]} : vector<8x2xf32> to vector<4x2xf32>
    %2 = vector.extract_strided_slice %0 {offsets = [4, 0], sizes = [4, 2], strides = [1, 1]} : vector<8x2xf32> to vector<4x2xf32>
    %3 = tpu.concatenate %1, %2 in 1 : vector<4x2xf32>, vector<4x2xf32> -> vector<4x4xf32>
    %cst = arith.constant dense<0.000000e+00> : vector<8x8xf32>
    %4 = tpu.matmul %0, %0, %cst {dimension_numbers = #tpu.dot_dimension_numbers<[1], [1], [0], [0], [0, 0, 1, 0], [], []>} : vector<8x2xf32>, vector<8x2xf32>, vector<8x8xf32> -> vector<8x8xf32>
    %cst_1 = arith.constant dense<0.000000e+00> : vector<4x4xf32>
    %5 = tpu.matmul %3, %3, %cst_1 {dimension_numbers = #tpu.dot_dimension_numbers<[0], [0], [1], [1], [0, 1, 1, 1], [], []>} : vector<4x4xf32>, vector<4x4xf32>, vector<4x4xf32> -> vector<4x4xf32>
    %c0_i32 = arith.constant 0 : i32
    %6 = arith.sitofp %c0_i32 : i32 to f32
    %7 = vector.broadcast %6 : f32 to vector<4x4xf32>
    %8 = tpu.concatenate %5, %7 in 0 : vector<4x4xf32>, vector<4x4xf32> -> vector<8x4xf32>
    %9 = tpu.concatenate %4, %8 in 1 : vector<8x8xf32>, vector<8x4xf32> -> vector<8x12xf32>
    %c0_i32_2 = arith.constant 0 : i32
    %10 = arith.sitofp %c0_i32_2 : i32 to f32
    %11 = vector.broadcast %10 : f32 to vector<8x116xf32>
    %12 = tpu.concatenate %9, %11 in 1 : vector<8x12xf32>, vector<8x116xf32> -> vector<8x128xf32>
    %c0_3 = arith.constant 0 : index
    %c0_4 = arith.constant 0 : index
    %13 = vector.load %arg1[%c0_3, %c0_4] : memref<8x128xf32, #tpu.memory_space<vmem>>, vector<8x128xf32>
    tpu.vector_store %arg1[%c0_3, %c0_4], %12 {strides = array<i32>} : memref<8x128xf32, #tpu.memory_space<vmem>>, vector<8x128xf32>,
    return
  }
}

</mosaic_0001>

<bundles_post_ra>
// kernel: model_forward.1
= control target key start
LH: loop header
LB: loop body
LE: loop exit
PB: predicated region body
PF: predicated region fallthrough
CT: control target
= control target key end

     0   :  { %v234_v1 = vmov 0.0   ;;  %vm235_vm0 = vmmov 0   ;;  %vm14_vm1 = vcmask 15360   ;;  %s236_s8 = smov 2   ;;  %vm124_vm2 = vcmask 1043456   ;;  %s254_s0 = inlined_call_operand.vmem [shape: f32[8,2], index: 0, kind: input, shape index: {}]   ;;  %s255_s1 = inlined_call_operand.vmem [shape: f32[8,128], index: 1, kind: output, shape index: {}]  }
   0x1   :  { %v8_v0 = vld [vmem:[%s254_s0] sm:$0xff]  ;;  %225 = vmatprep.subr.mxu1 %v234_v1  ;;  %227 = vmatprep.mubr.msk.f32.mxu1 %vm235_vm0, %v234_v1  ;;  %vm120_vm3 = vcmask 31744   ;;  %s237_s0 = smov 8   ;;  %vm203_vm4 = vcmask 64512   ;;  %vm205_vm5 = vcmask 97280  }
   0x2   :  { %v10_v2 = vrot.slane %v8_v0, 4  ;;  %220 = vmatprep.subr.mxu0 %v234_v1  ;;  %222 = vmatprep.mubr.msk.f32.mxu0 %vm235_vm0, %v234_v1 }
   0x3   :  { %221 = vmatpush3.xpose.msk.msra.mxu0 %vm14_vm1, %v8_v0 }
   0x4   :  { %11 = vrot.lane.b32.xlu0 %v10_v2, %s236_s8 }
   0x6   :  { %223 = vmatmul.mubr.msk.f32.vlgmr.msra.gmra.mrb[0].mxu0 %vm14_vm1, %v8_v0 }
  0x76   :  { %v12_v3 = vpop.permute.xlu0 %11 }
  0x77   :  { %v15_v4 = vsel %vm14_vm1, %v8_v0, %v12_v3 }
  0x78   :  { %88 = vxpose.xlu0.b32.start.end [1/1] (short) (narrow) %v15_v4, 8  ;;  %226 = vmatpush3.msk.msra.mxu1 %vm124_vm2, %v15_v4 }
  0xd9   :  { %v84_v6 = vpop.f32.mrb[0].mxu0 }
  0xda   :  { %v224_v7 = vpop.f32.mrb[1].mxu0 }
  0xf8   :  { %v104_v5 = vpop.trf.xlu0 }
  0xf9   :  { %228 = vmatmul.mubr.msk.f32.vlgmr.msra.gmra.mrb[0].mxu1 %vm120_vm3, %v104_v5 }
 0x1cc   :  { %v194_v8 = vpop.f32.mrb[0].mxu1 }
 0x1cd   :  { %v229_v9 = vpop.f32.mrb[1].mxu1  ;;  %v198_v10 = vsel %vm124_vm2, %v194_v8, 0.0 }
 0x1ce   :  { %200 = vrot.lane.b32.xlu1 %v198_v10, %s237_s0 }
 0x240   :  { %v201_v11 = vpop.permute.xlu1 %200 }
 0x241   :  { %v204_v12 = vsel %vm203_vm4, %v84_v6, %v201_v11 }
 0x242   :  { %v206_v13 = vsel %vm205_vm5, %v204_v12, 0.0 }
 0x243   :  { %207 = vst [vmem:[%s255_s1] sm:$0xff] %v206_v13 }

</bundles_post_ra>
